<compile_context>
chip_gen: v7x
topology: tpu7x:2x2x1
jax: 0.10.0
libtpu: 0.0.40
codegen_flags: <defaults>
</compile_context>

<pallas_src>
import math

import jax
import jax.numpy as jnp
from jax.experimental import pallas as pl
from jax.experimental.pallas import tpu as pltpu

LANE = 128     # vreg lane width  -> lane-dense outputs avoid masked stores
SUBLANE = 8    # f32 sublane count


def _round_up(n, m):
    return ((n + m - 1) // m) * m


# --------------------------------------------------------------------------
# Fused kernel: runs the whole (static) layer sequence back-to-back in VMEM.
# --------------------------------------------------------------------------
def _make_fused_kernel(kinds, emit_feats, feat_real, final_real, pack_pad):
    """kinds: tuple of 'L' (Linear) / 'R' (ReLU), e.g. ('L','R','L','R','L').

    Kernel refs: (x, w0, b0, w1, b1, ..., out[, packed_features]).
    Matmuls run on the MXU with bf16 inputs + f32 accumulation; bias add and
    ReLU stay f32 on the VPU; intermediate activations never leave VMEM.
    """
    n_linear = sum(1 for k in kinds if k == "L")

    def kernel(*refs):
        x_ref = refs[0]
        param_refs = refs[1:1 + 2 * n_linear]
        out_refs = refs[1 + 2 * n_linear:]
        final_ref = out_refs[0]

        h = x_ref[...]                      # f32 activations
        feats = []
        li = 0
        for kind in kinds:                  # static Python unroll
            if kind == "L":
                w = param_refs[2 * li][...]      # bf16, pre-transposed / padded
                b = param_refs[2 * li + 1][...]  # f32, lane-padded
                h = jnp.dot(h.astype(jnp.bfloat16), w,
                            preferred_element_type=jnp.float32) + b
                li += 1
            else:                           # ReLU
                h = jnp.maximum(h, 0.0)
                if emit_feats:
                    feats.append(h[:, :feat_real[len(feats)]])

        final_ref[...] = h[:, :final_real].astype(final_ref.dtype)

        if emit_feats and feats:
            packed = feats[0] if len(feats) == 1 else jnp.concatenate(feats, axis=-1)
            if pack_pad:
                packed = jnp.concatenate(
                    [packed, jnp.zeros((packed.shape[0], pack_pad), packed.dtype)],
                    axis=-1)
            out_refs[1][...] = packed.astype(out_refs[1].dtype)

    return kernel


# --------------------------------------------------------------------------
# Layer classes (mimic torch.nn.Linear / torch.nn.ReLU)
# --------------------------------------------------------------------------
class Linear:
    def __init__(self, key, in_features, out_features, dtype=jnp.float32):
        kw, kb = jax.random.split(key)
        bound = 1.0 / math.sqrt(in_features)
        # PyTorch layout kept for the pure-JAX reference.
        self.weight = jax.random.uniform(
            kw, (out_features, in_features), dtype, -bound, bound)
        self.bias = jax.random.uniform(kb, (out_features,), dtype, -bound, bound)
        self.in_features = in_features
        self.out_features = out_features

        din_p = _round_up(in_features, LANE)
        dout_p = _round_up(out_features, LANE)
        w_t = self.weight.T.astype(jnp.bfloat16)          # (in, out), bf16

        # bf16, output-dim padded only: used when this layer consumes the raw
        # (unpadded) kernel input.
        self.w_first_bf16 = (
            jnp.zeros((in_features, dout_p), jnp.bfloat16)
            .at[:, :out_features].set(w_t))

        # bf16, both dims lane-padded: used when this layer consumes a padded
        # intermediate activation (padded rows/cols are zero -> exactness kept).
        self.w_mid_bf16 = (
            jnp.zeros((din_p, dout_p), jnp.bfloat16)
            .at[:in_features, :out_features].set(w_t))

        # f32 bias, lane-padded.
        self.b_padded = (
            jnp.zeros((1, dout_p), jnp.float32)
            .at[0, :out_features].set(self.bias.astype(jnp.float32)))

        self.din_padded = din_p
        self.dout_padded = dout_p


class ReLU:
    """Marker class; ReLU is fused inside the single Pallas kernel."""
    pass


# --------------------------------------------------------------------------
# Sequential container with my_sequential.forward semantics
# --------------------------------------------------------------------------
class MySequential:
    def __init__(self, *layers):
        self.layers = list(layers)
        self.num_layers = len(layers)
        self.num_feature = sum(1 for l in layers if isinstance(l, ReLU))
        self._call_cache = {}

    # ---- single fused pallas_call over a (possibly truncated) layer chain ----
    def _run_fused(self, x, layer_subset, collect_features):
        kinds = tuple("L" if isinstance(l, Linear) else "R" for l in layer_subset)
        linears = [l for l in layer_subset if isinstance(l, Linear)]

        B, Din = x.shape

        # ---- batch tiling: fixed tile, batch padded UP to a tile multiple ----
        B8 = _round_up(B, SUBLANE)
        # Tiny batch: one block (call is launch/DMA-bound anyway).
        # Big batch:  256-row tile -> >= 2 parallel grid steps (v7x 2x TC),
        #             M >= 256 fills the 256x256 MXU on v6e/v7x.
        b_tile = B8 if B8 <= 256 else 256
        B_pad = _round_up(B, b_tile)
        grid = (B_pad // b_tile,)

        x_in = x if B_pad == B else jnp.zeros((B_pad, Din), x.dtype).at[:B, :].set(x)

        # Walk real (unpadded) widths through the chain.
        cur_real = Din
        feat_real = []
        for l in layer_subset:
            if isinstance(l, Linear):
                cur_real = l.out_features
            elif collect_features:
                feat_real.append(cur_real)
        final_real = cur_real

        feat_total = sum(feat_real)
        pack_width = _round_up(feat_total, LANE) if feat_total else 0
        pack_pad = pack_width - feat_total
        emit_feats = collect_features and pack_width > 0

        params = []
        for idx, l in enumerate(linears):
            params.append(l.w_first_bf16 if idx == 0 else l.w_mid_bf16)
            params.append(l.b_padded)

        out_shapes = [jax.ShapeDtypeStruct((B_pad, final_real), x.dtype)]
        if emit_feats:
            out_shapes.append(jax.ShapeDtypeStruct((B_pad, pack_width), x.dtype))

        key = (kinds, emit_feats, B_pad, b_tile, Din)
        call = self._call_cache.get(key)
        if call is None:
            kernel = _make_fused_kernel(
                kinds, emit_feats, tuple(feat_real), final_real, pack_pad)

            in_specs = [pl.BlockSpec((b_tile, Din), lambda i: (i, 0))]
            for idx, l in enumerate(linears):
                w = params[2 * idx]
                # Constant index_map -> resident weight block, no per-step DMA.
                in_specs.append(pl.BlockSpec(w.shape, lambda i: (0, 0)))
                in_specs.append(pl.BlockSpec((1, l.dout_padded), lambda i: (0, 0)))

            out_specs_list = [pl.BlockSpec((b_tile, final_real), lambda i: (i, 0))]
            if emit_feats:
                out_specs_list.append(
                    pl.BlockSpec((b_tile, pack_width), lambda i: (i, 0)))

            # Cost estimate from REAL (unpadded) dims — advisory to XLA.
            flops = 2 * B * sum(l.in_features * l.out_features for l in linears)
            bytes_accessed = (
                int(x.size) * x.dtype.itemsize
                + sum(int(p.size) * p.dtype.itemsize for p in params)
                + sum(s.shape[0] * s.shape[1] * 4 for s in out_shapes))

            call = pl.pallas_call(
                kernel,
                out_shape=tuple(out_shapes) if len(out_shapes) > 1 else out_shapes[0],
                grid=grid,
                in_specs=in_specs,
                out_specs=(tuple(out_specs_list) if len(out_specs_list) > 1
                           else out_specs_list[0]),
                compiler_params=pltpu.CompilerParams(
                    dimension_semantics=("parallel",)),
                cost_estimate=pl.CostEstimate(
                    flops=flops, transcendentals=0,
                    bytes_accessed=bytes_accessed),
            )
            self._call_cache[key] = call

        outs = call(x_in, *params)
        if not isinstance(outs, (tuple, list)):
            outs = (outs,)

        final = outs[0] if B_pad == B else outs[0][:B]
        feats = []
        if emit_feats:
            packed = outs[1] if B_pad == B else outs[1][:B]
            off = 0
            for w_real in feat_real:
                feats.append(packed[:, off:off + w_real])
                off += w_real
        return final, feats

    # ---- my_sequential.forward semantics ----
    def forward(self, x, get_features=False, return_index=None):
        # Early-return path: run ONLY the layers up to the matching ReLU,
        # as a truncated fused kernel (still a single pallas_call).
        if (get_features and isinstance(return_index, int)
                and 0 <= return_index < self.num_feature):
            relu_seen = -1
            end = self.num_layers
            for i, l in enumerate(self.layers):
                if isinstance(l, ReLU):
                    relu_seen += 1
                    if relu_seen == return_index:
                        end = i + 1
                        break
            out, _ = self._run_fused(x, self.layers[:end], collect_features=False)
            return out  # == feature[return_index]

        if get_features:
            out, feats = self._run_fused(x, self.layers, collect_features=True)
            return out, feats

        out, _ = self._run_fused(x, self.layers, collect_features=False)
        return out

    __call__ = forward


# --------------------------------------------------------------------------
# Self-check
# --------------------------------------------------------------------------
if __name__ == "__main__":
    key = jax.random.PRNGKey(0)
    k_in, k1, k2, k3 = jax.random.split(key, 4)

    batch, d_in, d_hidden, d_out = 8, 32, 64, 16
    x = jax.random.normal(k_in, (batch, d_in), jnp.float32)

    model = MySequential(
        Linear(k1, d_in, d_hidden),
        ReLU(),
        Linear(k2, d_hidden, d_hidden),
        ReLU(),
        Linear(k3, d_hidden, d_out),
    )

    # plain forward
    y = jax.block_until_ready(model(x))

    # forward with feature collection and early-return paths
    y_full, feats = model(x, get_features=True)
    f0 = model(x, get_features=True, return_index=0)
    f1 = model(x, get_features=True, return_index=1)
    jax.block_until_ready((y_full, feats, f0, f1))

    # pure-JAX references (PyTorch-layout weights).
    # emulate_bf16=True mirrors the kernel's bf16 MXU inputs / f32 accumulation.
    def ref_forward(xv, emulate_bf16):
        h = xv
        feats_ref = []
        for l in model.layers:
            if isinstance(l, Linear):
                if emulate_bf16:
                    hb = h.astype(jnp.bfloat16).astype(jnp.float32)
                    wb = l.weight.T.astype(jnp.bfloat16).astype(jnp.float32)
                    h = hb @ wb + l.bias
                else:
                    h = h @ l.weight.T + l.bias
            else:
                h = jnp.maximum(h, 0.0)
                feats_ref.append(h)
        return h, feats_ref

    y_bf, feats_bf = ref_forward(x, True)
    y_f32, feats_f32 = ref_forward(x, False)

    assert y.shape == (batch, d_out)
    assert len(feats) == model.num_feature == 2
    assert f0.shape == (batch, d_hidden)
    assert f1.shape == (batch, d_hidden)

    # tight check against the bf16-weight reference
    TOL = dict(atol=5e-3, rtol=5e-3)
    assert jnp.allclose(y, y_bf, **TOL)
    assert jnp.allclose(y_full, y_bf, **TOL)
    for f, fr in zip(feats, feats_bf):
        assert jnp.allclose(f, fr, **TOL)
    assert jnp.allclose(f0, feats_bf[0], **TOL)
    assert jnp.allclose(f1, feats_bf[1], **TOL)

    # loose check against the full-f32 PyTorch-semantics reference
    LTOL = dict(atol=5e-2, rtol=5e-2)
    assert jnp.allclose(y, y_f32, **LTOL)
    assert jnp.allclose(y_full, y_f32, **LTOL)
    for f, fr in zip(feats, feats_f32):
        assert jnp.allclose(f, fr, **LTOL)

    print("KERNEL_OK")
</pallas_src>

<mosaic_0001>
module attributes {stable_mosaic.version = 11 : i64} {
  func.func @kernel(%arg0: i32, %arg1: memref<8x32xf32, #tpu.memory_space<vmem>>, %arg2: memref<32x128xbf16, #tpu.memory_space<vmem>>, %arg3: memref<1x128xf32, #tpu.memory_space<vmem>>, %arg4: memref<128x128xbf16, #tpu.memory_space<vmem>>, %arg5: memref<1x128xf32, #tpu.memory_space<vmem>>, %arg6: memref<128x128xbf16, #tpu.memory_space<vmem>>, %arg7: memref<1x128xf32, #tpu.memory_space<vmem>>, %arg8: memref<8x16xf32, #tpu.memory_space<vmem>>) attributes {dimension_semantics = [#tpu.dimension_semantics<parallel>], iteration_bounds = array<i64: 1>, scalar_prefetch = 0 : i64, scratch_operands = 0 : i64, tpu.core_type = #tpu.core_type<tc>, window_params = [{transform_indices = @transform_0, window_bounds = array<i64: 8, 32>}, {pipeline_mode = #tpu.pipeline_mode<synchronous>, transform_indices = @transform_1, window_bounds = array<i64: 32, 128>}, {pipeline_mode = #tpu.pipeline_mode<synchronous>, transform_indices = @transform_2, window_bounds = array<i64: 1, 128>}, {pipeline_mode = #tpu.pipeline_mode<synchronous>, transform_indices = @transform_3, window_bounds = array<i64: 128, 128>}, {pipeline_mode = #tpu.pipeline_mode<synchronous>, transform_indices = @transform_4, window_bounds = array<i64: 1, 128>}, {pipeline_mode = #tpu.pipeline_mode<synchronous>, transform_indices = @transform_5, window_bounds = array<i64: 128, 128>}, {pipeline_mode = #tpu.pipeline_mode<synchronous>, transform_indices = @transform_6, window_bounds = array<i64: 1, 128>}, {transform_indices = @transform_7, window_bounds = array<i64: 8, 16>}]} {
    %c0 = arith.constant 0 : index
    %c0_0 = arith.constant 0 : index
    %0 = vector.load %arg1[%c0, %c0_0] : memref<8x32xf32, #tpu.memory_space<vmem>>, vector<8x32xf32>
    %c0_1 = arith.constant 0 : index
    %c0_2 = arith.constant 0 : index
    %1 = vector.load %arg2[%c0_1, %c0_2] : memref<32x128xbf16, #tpu.memory_space<vmem>>, vector<32x128xbf16>
    %c0_3 = arith.constant 0 : index
    %c0_4 = arith.constant 0 : index
    %2 = vector.load %arg3[%c0_3, %c0_4] : memref<1x128xf32, #tpu.memory_space<vmem>>, vector<1x128xf32>
    %3 = arith.truncf %0 : vector<8x32xf32> to vector<8x32xbf16>
    %cst = arith.constant dense<0.000000e+00> : vector<8x128xf32>
    %4 = tpu.matmul %3, %1, %cst {dimension_numbers = #tpu.dot_dimension_numbers<[1], [0], [0], [1], [0, 0, 1, 1], [], []>} : vector<8x32xbf16>, vector<32x128xbf16>, vector<8x128xf32> -> vector<8x128xf32>
    %5 = vector.broadcast %2 : vector<1x128xf32> to vector<8x128xf32>
    %6 = arith.addf %4, %5 : vector<8x128xf32>
    %cst_5 = arith.constant 0.000000e+00 : f32
    %7 = vector.broadcast %cst_5 : f32 to vector<8x128xf32>
    %8 = arith.maximumf %6, %7 : vector<8x128xf32>
    %c0_6 = arith.constant 0 : index
    %c0_7 = arith.constant 0 : index
    %9 = vector.load %arg4[%c0_6, %c0_7] : memref<128x128xbf16, #tpu.memory_space<vmem>>, vector<128x128xbf16>
    %c0_8 = arith.constant 0 : index
    %c0_9 = arith.constant 0 : index
    %10 = vector.load %arg5[%c0_8, %c0_9] : memref<1x128xf32, #tpu.memory_space<vmem>>, vector<1x128xf32>
    %11 = arith.truncf %8 : vector<8x128xf32> to vector<8x128xbf16>
    %cst_10 = arith.constant dense<0.000000e+00> : vector<8x128xf32>
    %12 = tpu.matmul %11, %9, %cst_10 {dimension_numbers = #tpu.dot_dimension_numbers<[1], [0], [0], [1], [0, 0, 1, 1], [], []>} : vector<8x128xbf16>, vector<128x128xbf16>, vector<8x128xf32> -> vector<8x128xf32>
    %13 = vector.broadcast %10 : vector<1x128xf32> to vector<8x128xf32>
    %14 = arith.addf %12, %13 : vector<8x128xf32>
    %cst_11 = arith.constant 0.000000e+00 : f32
    %15 = vector.broadcast %cst_11 : f32 to vector<8x128xf32>
    %16 = arith.maximumf %14, %15 : vector<8x128xf32>
    %c0_12 = arith.constant 0 : index
    %c0_13 = arith.constant 0 : index
    %17 = vector.load %arg6[%c0_12, %c0_13] : memref<128x128xbf16, #tpu.memory_space<vmem>>, vector<128x128xbf16>
    %c0_14 = arith.constant 0 : index
    %c0_15 = arith.constant 0 : index
    %18 = vector.load %arg7[%c0_14, %c0_15] : memref<1x128xf32, #tpu.memory_space<vmem>>, vector<1x128xf32>
    %19 = arith.truncf %16 : vector<8x128xf32> to vector<8x128xbf16>
    %cst_16 = arith.constant dense<0.000000e+00> : vector<8x128xf32>
    %20 = tpu.matmul %19, %17, %cst_16 {dimension_numbers = #tpu.dot_dimension_numbers<[1], [0], [0], [1], [0, 0, 1, 1], [], []>} : vector<8x128xbf16>, vector<128x128xbf16>, vector<8x128xf32> -> vector<8x128xf32>
    %21 = vector.broadcast %18 : vector<1x128xf32> to vector<8x128xf32>
    %22 = arith.addf %20, %21 : vector<8x128xf32>
    %23 = vector.extract_strided_slice %22 {offsets = [0, 0], sizes = [8, 16], strides = [1, 1]} : vector<8x128xf32> to vector<8x16xf32>
    %c0_17 = arith.constant 0 : index
    %c0_18 = arith.constant 0 : index
    %24 = vector.load %arg8[%c0_17, %c0_18] : memref<8x16xf32, #tpu.memory_space<vmem>>, vector<8x16xf32>
    tpu.vector_store %arg8[%c0_17, %c0_18], %23 {strides = array<i32>} : memref<8x16xf32, #tpu.memory_space<vmem>>, vector<8x16xf32>,
    return
  }
  func.func @transform_0(%arg0: i32) -> (i32, i32) {
    %c0_i32 = arith.constant 0 : i32
    %c0_i32_0 = arith.constant 0 : i32
    return %arg0, %c0_i32 : i32, i32
  }
  func.func @transform_1(%arg0: i32) -> (i32, i32) {
    %c0_i32 = arith.constant 0 : i32
    %c0_i32_0 = arith.constant 0 : i32
    %c0_i32_1 = arith.constant 0 : i32
    return %c0_i32, %c0_i32_0 : i32, i32
  }
  func.func @transform_2(%arg0: i32) -> (i32, i32) {
    %c0_i32 = arith.constant 0 : i32
    %c0_i32_0 = arith.constant 0 : i32
    %c0_i32_1 = arith.constant 0 : i32
    return %c0_i32, %c0_i32_0 : i32, i32
  }
  func.func @transform_3(%arg0: i32) -> (i32, i32) {
    %c0_i32 = arith.constant 0 : i32
    %c0_i32_0 = arith.constant 0 : i32
    %c0_i32_1 = arith.constant 0 : i32
    return %c0_i32, %c0_i32_0 : i32, i32
  }
  func.func @transform_4(%arg0: i32) -> (i32, i32) {
    %c0_i32 = arith.constant 0 : i32
    %c0_i32_0 = arith.constant 0 : i32
    %c0_i32_1 = arith.constant 0 : i32
    return %c0_i32, %c0_i32_0 : i32, i32
  }
  func.func @transform_5(%arg0: i32) -> (i32, i32) {
    %c0_i32 = arith.constant 0 : i32
    %c0_i32_0 = arith.constant 0 : i32
    %c0_i32_1 = arith.constant 0 : i32
    return %c0_i32, %c0_i32_0 : i32, i32
  }
  func.func @transform_6(%arg0: i32) -> (i32, i32) {
    %c0_i32 = arith.constant 0 : i32
    %c0_i32_0 = arith.constant 0 : i32
    %c0_i32_1 = arith.constant 0 : i32
    return %c0_i32, %c0_i32_0 : i32, i32
  }
  func.func @transform_7(%arg0: i32) -> (i32, i32) {
    %c0_i32 = arith.constant 0 : i32
    %c0_i32_0 = arith.constant 0 : i32
    return %arg0, %c0_i32 : i32, i32
  }
}

</mosaic_0001>

<bundles_post_ra>
// kernel: tpu_custom_call.1
= control target key start
LH: loop header
LB: loop body
LE: loop exit
PB: predicated region body
PF: predicated region fallthrough
CT: control target
= control target key end

     0   :  { %12 = vsyncpa [#allocation3], 0  ;;  %s782_s0 = inlined_call_operand.hbm [shape: f32[8,32], index: 0, kind: input, shape index: {}]   ;;  %s783_s1 = inlined_call_operand.hbm [shape: bf16[32,128], index: 1, kind: input, shape index: {}]   ;;  %s784_s2 = inlined_call_operand.vmem [shape: f32[1,128], index: 2, kind: input, shape index: {}]   ;;  %s785_s3 = inlined_call_operand.hbm [shape: bf16[128,128], index: 3, kind: input, shape index: {}]   ;;  %s786_s4 = inlined_call_operand.vmem [shape: f32[1,128], index: 4, kind: input, shape index: {}]   ;;  %s787_s5 = inlined_call_operand.hbm [shape: bf16[128,128], index: 5, kind: input, shape index: {}]   ;;  %s788_s6 = inlined_call_operand.vmem [shape: f32[1,128], index: 6, kind: input, shape index: {}]   ;;  %s789_s7 = inlined_call_operand.hbm [shape: f32[8,16], index: 7, kind: output, shape index: {}]  }
   0x1   :  { %13 = vsyncpa [#allocation6], 0 }
   0x2   :  { %14 = vsyncpa [#allocation9], 0 }
   0x3   :  { %15 = vsyncpa [#allocation4], 0  ;;  %s631_s24 = smov [#allocation5]   ;;  %s513_s28 = scalar_lea.hbm %s783_s1, 256 }
   0x4   :  { %s31_s25 = sshll.u32 %s631_s24, 4  ;;  %p514_p0 = scmp.ne.s32.totalorder %s783_s1, %s513_s28  ;;  %s32_s25 = int_to_ptr.vmem [resolvable:$true] %s31_s25 }
   0x5   :  { %p517_p1 = scmp.lt.u32.totalorder %s513_s28, %s783_s1 }
   0x7   :  { %p519_p2 = pnand %p517_p1, %p514_p0 }
   0x9   :  { %522 = shalt.err (!%p519_p2)
}
   0xa   :  { %s523_s10 = scalar_lea.vmem %s32_s25, 256  ;;  %p528_p4 = scmp.lt.s32.totalorder %s32_s25, %s32_s25 }
   0xb   :  { %p524_p3 = scmp.ne.s32.totalorder %s32_s25, %s523_s10  ;;  %p529_p5 = scmp.lt.s32.totalorder %s523_s10, %s523_s10 }
   0xd   :  { %p530_p6 = por %p529_p5, %p528_p4 }
   0xf   :  { %p531_p7 = pnand %p530_p6, %p524_p3 }
  0x11   :  { %534 = shalt.err (!%p531_p7)
}
  0x12   :  { %s632_s11 = smov 64   ;;  %s633_s12 = smov 4  }
  0x13   :  { %37 = dma.hbm_to_vmem [thread:$0]  %s783_s1, 256, %s32_s25, [#allocation6], %s632_s11, %s632_s11, %s633_s12  }
  0x14   :  { %s634_s15 = smov [#allocation2]   ;;  %s635_s17 = smov [#allocation7]  }
  0x15   :  { %s22_s16 = sshll.u32 %s634_s15, 4  ;;  %s45_s18 = sshll.u32 %s635_s17, 4  ;;  %s23_s16 = int_to_ptr.vmem [resolvable:$true] %s22_s16  ;;  %s46_s18 = int_to_ptr.vmem [resolvable:$true] %s45_s18 }
  0x16   :  { %s535_s21 = scalar_lea.hbm %s782_s0, 128 }
  0x17   :  { %p536_p8 = scmp.ne.s32.totalorder %s782_s0, %s535_s21  ;;  %p539_p9 = scmp.lt.u32.totalorder %s535_s21, %s782_s0 }
  0x19   :  { %p541_p10 = pnand %p539_p9, %p536_p8 }
  0x1b   :  { %544 = shalt.err (!%p541_p10)
}
  0x1c   :  { %s545_s1 = scalar_lea.vmem %s23_s16, 128  ;;  %p550_p12 = scmp.lt.s32.totalorder %s23_s16, %s23_s16 }
  0x1d   :  { %p546_p11 = scmp.ne.s32.totalorder %s23_s16, %s545_s1  ;;  %p551_p13 = scmp.lt.s32.totalorder %s545_s1, %s545_s1 }
  0x1f   :  { %p552_p0 = por %p551_p13, %p550_p12 }
  0x21   :  { %p553_p1 = pnand %p552_p0, %p546_p11 }
  0x23   :  { %556 = shalt.err (!%p553_p1)
}
  0x24   :  { %25 = dma.hbm_to_vmem [thread:$0]  %s782_s0, 128, %s23_s16, [#allocation3]  }
  0x25   :  { %s557_s30 = scalar_lea.hbm %s785_s3, 1024 }
  0x26   :  { %p558_p2 = scmp.ne.s32.totalorder %s785_s3, %s557_s30  ;;  %p561_p3 = scmp.lt.u32.totalorder %s557_s30, %s785_s3 }
  0x28   :  { %p563_p4 = pnand %p561_p3, %p558_p2 }
  0x2a   :  { %566 = shalt.err (!%p563_p4)
}
  0x2b   :  { %s567_s14 = scalar_lea.vmem %s46_s18, 1024  ;;  %p572_p6 = scmp.lt.s32.totalorder %s46_s18, %s46_s18 }
  0x2c   :  { %p568_p5 = scmp.ne.s32.totalorder %s46_s18, %s567_s14  ;;  %p573_p7 = scmp.lt.s32.totalorder %s567_s14, %s567_s14 }
  0x2e   :  { %p574_p8 = por %p573_p7, %p572_p6 }
  0x30   :  { %p575_p9 = pnand %p574_p8, %p568_p5 }
  0x32   :  { %578 = shalt.err (!%p575_p9)
}
  0x33   :  { %51 = dma.hbm_to_vmem [thread:$0]  %s785_s3, 1024, %s46_s18, [#allocation6], %s632_s11, %s632_s11, %s633_s12  }
  0x34   :  { %s636_s16 = smov [#allocation8]   ;;  %s579_s21 = scalar_lea.hbm %s787_s5, 1024 }
  0x35   :  { %s59_s17 = sshll.u32 %s636_s16, 4  ;;  %p580_p10 = scmp.ne.s32.totalorder %s787_s5, %s579_s21  ;;  %s60_s17 = int_to_ptr.vmem [resolvable:$true] %s59_s17 }
  0x36   :  { %p583_p11 = scmp.lt.u32.totalorder %s579_s21, %s787_s5 }
  0x38   :  { %p585_p12 = pnand %p583_p11, %p580_p10 }
  0x3a   :  { %588 = shalt.err (!%p585_p12)
}
  0x3b   :  { %s589_s1 = scalar_lea.vmem %s60_s17, 1024  ;;  %p594_p0 = scmp.lt.s32.totalorder %s60_s17, %s60_s17 }
  0x3c   :  { %p590_p13 = scmp.ne.s32.totalorder %s60_s17, %s589_s1  ;;  %p595_p1 = scmp.lt.s32.totalorder %s589_s1, %s589_s1 }
  0x3e   :  { %p596_p2 = por %p595_p1, %p594_p0 }
  0x40   :  { %p597_p3 = pnand %p596_p2, %p590_p13 }
  0x42   :  { %600 = shalt.err (!%p597_p3)
}
  0x43   :  { %65 = dma.hbm_to_vmem [thread:$0]  %s787_s5, 1024, %s60_s17, [#allocation9], %s632_s11, %s632_s11, %s633_s12  }
  0x44   :  { %623 = dma.done.wait [#allocation3], 128  }
  0x45   :  { %624 = vsyncadd [#allocation3], 4294967168 }
  0x46   :  { %625 = dma.done.wait [#allocation6], 1280  }
  0x47   :  { %626 = vsyncadd [#allocation6], 4294966016 }
  0x48   :  { %627 = dma.done.wait [#allocation9], 1024  }
  0x49   :  { %628 = vsyncadd [#allocation9], 4294966272  ;;  %v637_v0 = vmov 0.0   ;;  %vm638_vm0 = vmmov 0   ;;  %v495_v1 = vld [vmem:[#allocation5] sm:$0xff]   ;;  %v496_v2 = vld [vmem:[#allocation5 + $0x8] sm:$0xff]  }
  0x4a   :  { %438 = vmatprep.subr.bf16.mxu0 %v637_v0  ;;  %442 = vmatprep.mubr.msk.bf16.mxu0 %vm638_vm0, %v637_v0  ;;  %v81_v3 = vld [vmem:[#allocation2] sm:$0xff]  ;;  %v497_v4 = vld [vmem:[#allocation7] sm:$0xff]   ;;  %vm106_vm1 = vcmask 261120   ;;  %v499_v7 = vld [vmem:[#allocation7 + $0x10] sm:$0xff]   ;;  %s639_s28 = smov [#allocation10]   ;;  %vm376_vm2 = vcmask 130048  }
  0x4b   :  { %446 = vmatprep.subr.bf16.mxu1 %v637_v0  ;;  %462 = vmatprep.mubr.msk.bf16.mxu1 %vm638_vm0, %v637_v0  ;;  %v87_v5 = vpack.c.bf16 %v81_v3, %v81_v3  ;;  %v498_v6 = vld [vmem:[#allocation7 + $0x8] sm:$0xff]   ;;  %v500_v8 = vld [vmem:[#allocation7 + $0x18] sm:$0xff]   ;;  %v501_v9 = vld [vmem:[#allocation7 + $0x20] sm:$0xff]   ;;  %s384_s29 = sshll.u32 %s639_s28, 4  ;;  %s385_s29 = int_to_ptr.vmem [resolvable:$true] %s384_s29 }
  0x4c   :  { %439 = vmatpush3.bf16.msra.mxu0 %v495_v1  ;;  %447 = vmatpush3.bf16.msra.mxu1 %v497_v4  ;;  %v502_v10 = vld [vmem:[#allocation7 + $0x28] sm:$0xff]   ;;  %v503_v11 = vld [vmem:[#allocation7 + $0x30] sm:$0xff]   ;;  %v504_v12 = vld [vmem:[#allocation7 + $0x38] sm:$0xff]   ;;  %p606_p5 = scmp.lt.s32.totalorder %s385_s29, %s385_s29 }
  0x4d   :  { %440 = vmatprep.subr.bf16.mxu0 %v637_v0  ;;  %448 = vmatprep.subr.bf16.mxu1 %v637_v0  ;;  %v505_v13 = vld [vmem:[#allocation8] sm:$0xff]   ;;  %v506_v14 = vld [vmem:[#allocation8 + $0x8] sm:$0xff]   ;;  %v507_v15 = vld [vmem:[#allocation8 + $0x10] sm:$0xff]  }
  0x4e   :  { %v508_v16 = vld [vmem:[#allocation8 + $0x18] sm:$0xff]   ;;  %v509_v17 = vld [vmem:[#allocation8 + $0x20] sm:$0xff]   ;;  %v510_v18 = vld [vmem:[#allocation8 + $0x28] sm:$0xff]  }
  0x4f   :  { %v395_v19 = vld [vmem:[%s784_s2] ss:$0 sm:$0xff]  ;;  %v511_v27 = vld [vmem:[#allocation8 + $0x30] sm:$0xff]   ;;  %v512_v28 = vld [vmem:[#allocation8 + $0x38] sm:$0xff]  }
  0x50   :  { %441 = vmatpush3.bf16.msra.mxu0 %v496_v2  ;;  %449 = vmatpush3.bf16.msra.mxu1 %v498_v6  ;;  %v399_v29 = vld [vmem:[%s786_s4] ss:$0 sm:$0xff]  ;;  %s601_s4 = scalar_lea.vmem %s385_s29, 128 }
  0x51   :  { %466 = vmatprep.subr.bf16.mxu0 %v637_v0  ;;  %450 = vmatprep.subr.bf16.mxu1 %v637_v0  ;;  %v408_v37 = vld [vmem:[%s788_s6] ss:$0 sm:$0xff]  ;;  %p602_p4 = scmp.ne.s32.totalorder %s385_s29, %s601_s4  ;;  %p607_p6 = scmp.lt.s32.totalorder %s601_s4, %s601_s4 }
  0x53   :  { %443 = vmatmul.mubr.msk.bf16.vlgmr.msra.gmra.mrb[0].mxu0 %vm106_vm1, %v87_v5  ;;  %p608_p7 = por %p607_p6, %p606_p5 }
  0x54   :  { %482 = vmatprep.mubr.msk.bf16.mxu0 %vm638_vm0, %v637_v0  ;;  %451 = vmatpush3.bf16.msra.mxu1 %v499_v7 }
  0x55   :  { %452 = vmatprep.subr.bf16.mxu1 %v637_v0  ;;  %467 = vmatpush3.bf16.msra.mxu0 %v505_v13  ;;  %p609_p8 = pnand %p608_p7, %p602_p4 }
  0x56   :  { %468 = vmatprep.subr.bf16.mxu0 %v637_v0 }
  0x58   :  { %453 = vmatpush3.bf16.msra.mxu1 %v500_v8 }
  0x59   :  { %454 = vmatprep.subr.bf16.mxu1 %v637_v0  ;;  %469 = vmatpush3.bf16.msra.mxu0 %v506_v14 }
  0x5a   :  { %470 = vmatprep.subr.bf16.mxu0 %v637_v0 }
  0x5c   :  { %455 = vmatpush3.bf16.msra.mxu1 %v501_v9 }
  0x5d   :  { %456 = vmatprep.subr.bf16.mxu1 %v637_v0  ;;  %471 = vmatpush3.bf16.msra.mxu0 %v507_v15 }
  0x5e   :  { %472 = vmatprep.subr.bf16.mxu0 %v637_v0 }
  0x60   :  { %457 = vmatpush3.bf16.msra.mxu1 %v502_v10 }
  0x61   :  { %458 = vmatprep.subr.bf16.mxu1 %v637_v0  ;;  %473 = vmatpush3.bf16.msra.mxu0 %v508_v16 }
  0x62   :  { %474 = vmatprep.subr.bf16.mxu0 %v637_v0 }
  0x64   :  { %459 = vmatpush3.bf16.msra.mxu1 %v503_v11 }
  0x65   :  { %460 = vmatprep.subr.bf16.mxu1 %v637_v0  ;;  %475 = vmatpush3.bf16.msra.mxu0 %v509_v17 }
  0x66   :  { %476 = vmatprep.subr.bf16.mxu0 %v637_v0 }
  0x68   :  { %461 = vmatpush3.bf16.msra.mxu1 %v504_v12 }
  0x69   :  { %477 = vmatpush3.bf16.msra.mxu0 %v510_v18 }
  0x6a   :  { %478 = vmatprep.subr.bf16.mxu0 %v637_v0 }
  0x6d   :  { %479 = vmatpush3.bf16.msra.mxu0 %v511_v27 }
  0x6e   :  { %480 = vmatprep.subr.bf16.mxu0 %v637_v0 }
  0x71   :  { %481 = vmatpush3.bf16.msra.mxu0 %v512_v28 }
 0x126   :  { %v144_v20 = vpop.f32.mrb[0].mxu0 }
 0x127   :  { %v145_v21 = vadd.f32 %v395_v19, %v144_v20  ;;  %v444_v22 = vpop.f32.mrb[1].mxu0 }
 0x128   :  { %v147_v23 = vpop.f32.mrb[2].mxu0 }
 0x129   :  { %v150_v24 = vmax.f32 %v145_v21, 0.0  ;;  %v445_v25 = vpop.f32.mrb[3].mxu0 }
 0x12b   :  { %v168_v26 = vpack.c.bf16 %v150_v24, %v150_v24 }
 0x12d   :  { %463 = vmatmul.mubr.bf16.vlgmr.msra.gmra.mrb[0].mxu1 %v168_v26 }
 0x200   :  { %v257_v30 = vpop.f32.mrb[0].mxu1 }
 0x201   :  { %v258_v31 = vadd.f32 %v399_v29, %v257_v30  ;;  %v464_v32 = vpop.f32.mrb[1].mxu1 }
 0x202   :  { %v260_v33 = vpop.f32.mrb[2].mxu1 }
 0x203   :  { %v263_v34 = vmax.f32 %v258_v31, 0.0  ;;  %v465_v35 = vpop.f32.mrb[3].mxu1 }
 0x205   :  { %v281_v36 = vpack.c.bf16 %v263_v34, %v263_v34 }
 0x207   :  { %483 = vmatmul.mubr.bf16.vlgmr.msra.gmra.mrb[4].mxu0 %v281_v36 }
 0x2da   :  { %v370_v38 = vpop.f32.mrb[4].mxu0 }
 0x2db   :  { %v371_v39 = vadd.f32 %v408_v37, %v370_v38  ;;  %v484_v40 = vpop.f32.mrb[5].mxu0 }
 0x2dc   :  { %v373_v41 = vpop.f32.mrb[6].mxu0 }
 0x2dd   :  { %v485_v42 = vpop.f32.mrb[7].mxu0  ;;  %377 = vst.msk [vmem:[#allocation10] sm:$0xff] %vm376_vm2, %v371_v39 }
 0x2de   :  { %612 = shalt.err (!%p609_p8)
}
 0x2df   :  { %s613_s6 = scalar_lea.hbm %s789_s7, 128 }
 0x2e0   :  { %p614_p9 = scmp.ne.s32.totalorder %s789_s7, %s613_s6  ;;  %p617_p10 = scmp.lt.u32.totalorder %s613_s6, %s789_s7 }
 0x2e2   :  { %p619_p11 = pnand %p617_p10, %p614_p9 }
 0x2e4   :  { %622 = shalt.err (!%p619_p11)
}
 0x2e5   :  { %387 = dma.vmem_to_hbm [thread:$0]  %s385_s29, 128, %s789_s7, [#allocation4]  }
 0x2e6   :  { %629 = dma.done.wait [#allocation4], 128  }
 0x2e7   :  { %630 = vsyncadd [#allocation4], 4294967168 }
 0x2e8   :  { %391 = vsyncpa [#allocation3], 1 }
 0x2e9   :  { %392 = vsyncpa [#allocation6], 1 }
 0x2ea   :  { %393 = vsyncpa [#allocation9], 1 }
 0x2eb   :  { %394 = vsyncpa [#allocation4], 1 }

</bundles_post_ra>
